<compile_context>
chip_gen: v7x
topology: tpu7x:2x2x1
jax: 0.10.0
libtpu: 0.0.40
codegen_flags: <defaults>
</compile_context>

<pallas_src>
import math

import jax
import jax.numpy as jnp
from jax.experimental import pallas as pl
from jax.experimental.pallas import tpu as pltpu

_LANES = 128          # TPU vreg lane width
_MAX_TB = 512         # batch tile rows for large batches


def _actor_kernel(s_ref, w1_ref, b1_ref, w2_ref, b2_ref, wmu_ref, bmu_ref, mu_ref):
    # fc1 + ReLU  (bf16 operands on the MXU, f32 accumulation)
    h1 = jnp.dot(s_ref[...], w1_ref[...], preferred_element_type=jnp.float32)
    h1 = jnp.maximum(h1 + b1_ref[...], 0.0)
    # fc2 + ReLU
    h2 = jnp.dot(h1.astype(w2_ref.dtype), w2_ref[...],
                 preferred_element_type=jnp.float32)
    h2 = jnp.maximum(h2 + b2_ref[...], 0.0)
    # mu head + tanh (tanh lowers to the EUP -> free slot vs VALU/MXU)
    mu = jnp.dot(h2.astype(wmu_ref.dtype), wmu_ref[...],
                 preferred_element_type=jnp.float32)
    mu_ref[...] = jnp.tanh(mu + bmu_ref[...]).astype(mu_ref.dtype)


def actor_forward(state, params, *, compute_dtype=jnp.bfloat16):
    """Pallas-kernel forward of ActorNetwork.

    state: [B, input_dims] -> mu: [B, n_actions]
    """
    w1, b1, w2, b2, wmu, bmu = (
        params["w1"], params["b1"], params["w2"], params["b2"],
        params["wmu"], params["bmu"],
    )
    B, D_in = state.shape
    F1 = w1.shape[1]
    F2 = w2.shape[1]
    A = wmu.shape[1]

    # Lane-dense mu head: zero-pad output columns to a multiple of 128.
    A_pad = max(_LANES, ((A + _LANES - 1) // _LANES) * _LANES)
    if A_pad != A:
        wmu = jnp.pad(wmu, ((0, 0), (0, A_pad - A)))
        bmu = jnp.pad(bmu, ((0, 0), (0, A_pad - A)))

    # Batch tiling: single tile for small batches, _MAX_TB-row tiles otherwise.
    if B <= _MAX_TB:
        TB, B_pad, x = B, B, state
    else:
        TB = _MAX_TB
        B_pad = ((B + TB - 1) // TB) * TB
        x = jnp.pad(state, ((0, B_pad - B), (0, 0)))
    n_tiles = B_pad // TB

    # bf16 inputs / weights on the MXU, f32 biases.
    x = x.astype(compute_dtype)
    w1c, w2c, wmuc = (w.astype(compute_dtype) for w in (w1, w2, wmu))
    b1c, b2c, bmuc = (b.astype(jnp.float32) for b in (b1, b2, bmu))

    itemsize = jnp.dtype(compute_dtype).itemsize
    weight_bytes = ((D_in * F1 + F1 * F2 + F2 * A_pad) * itemsize
                    + (F1 + F2 + A_pad) * 4)
    # double-buffered input/output tiles + f32 intermediates + margin
    act_bytes = (2 * (TB * D_in * itemsize + TB * A_pad * 4)
                 + TB * (F1 + F2) * 4)
    vmem_limit = int(min(32 << 20, max(2 << 20, 4 * (weight_bytes + act_bytes))))

    cost = pl.CostEstimate(
        flops=2 * B_pad * (D_in * F1 + F1 * F2 + F2 * A_pad),
        transcendentals=B_pad * A_pad,
        bytes_accessed=(B_pad * D_in * itemsize + weight_bytes
                        + B_pad * A_pad * 4),
    )

    def resident(shape):
        # Same block every grid step -> stays in VMEM, no re-DMA.
        return pl.BlockSpec(shape, lambda i: tuple(0 for _ in shape))

    out = pl.pallas_call(
        _actor_kernel,
        out_shape=jax.ShapeDtypeStruct((B_pad, A_pad), jnp.float32),
        grid=(n_tiles,),
        in_specs=[
            pl.BlockSpec((TB, D_in), lambda i: (i, 0)),
            resident(w1c.shape), resident(b1c.shape),
            resident(w2c.shape), resident(b2c.shape),
            resident(wmuc.shape), resident(bmuc.shape),
        ],
        out_specs=pl.BlockSpec((TB, A_pad), lambda i: (i, 0)),
        compiler_params=pltpu.CompilerParams(
            dimension_semantics=("parallel",),
            vmem_limit_bytes=vmem_limit,
        ),
        cost_estimate=cost,
    )(x, w1c, b1c, w2c, b2c, wmuc, bmuc)

    return out[:B, :A]


def init_actor_params(key, input_dims, fc1_dims, fc2_dims, n_actions):
    """Deterministic init matching PyTorch nn.Linear default:
    U(-1/sqrt(fan_in), 1/sqrt(fan_in)) for both weight and bias."""
    def linear(key, fan_in, fan_out):
        kw, kb = jax.random.split(key)
        bound = 1.0 / math.sqrt(fan_in)
        # Stored as [in, out] (transposed vs torch's [out, in]) so kernel does x @ W.
        w = jax.random.uniform(kw, (fan_in, fan_out), jnp.float32, -bound, bound)
        b = jax.random.uniform(kb, (1, fan_out), jnp.float32, -bound, bound)
        return w, b

    k1, k2, k3 = jax.random.split(key, 3)
    w1, b1 = linear(k1, input_dims, fc1_dims)
    w2, b2 = linear(k2, fc1_dims, fc2_dims)
    wmu, bmu = linear(k3, fc2_dims, n_actions)
    return {"w1": w1, "b1": b1, "w2": w2, "b2": b2, "wmu": wmu, "bmu": bmu}


def actor_forward_ref(state, params):
    """Pure-JAX f32 reference for correctness checking."""
    h1 = jnp.maximum(state @ params["w1"] + params["b1"], 0.0)
    h2 = jnp.maximum(h1 @ params["w2"] + params["b2"], 0.0)
    return jnp.tanh(h2 @ params["wmu"] + params["bmu"])


if __name__ == "__main__":
    # Small shapes consistent with the module: input_dims=[32], fc1=64, fc2=32,
    # n_actions=2, batch=8.
    batch, input_dims, n_actions = 8, 32, 2
    fc1_dims, fc2_dims = 64, 32

    key = jax.random.PRNGKey(0)
    kp, ks = jax.random.split(key)

    params = init_actor_params(kp, input_dims, fc1_dims, fc2_dims, n_actions)
    state = jax.random.normal(ks, (batch, input_dims), jnp.float32)

    mu = actor_forward(state, params)
    mu = jax.block_until_ready(mu)

    mu_ref = actor_forward_ref(state, params)
    assert mu.shape == (batch, n_actions), mu.shape
    # bf16 operands with f32 accumulation -> loose-ish tolerance.
    assert jnp.allclose(mu, mu_ref, atol=3e-2, rtol=3e-2), (mu, mu_ref)
    assert jnp.all(jnp.abs(mu) <= 1.0 + 1e-6)

    print("KERNEL_OK")
</pallas_src>

<mosaic_0001>
module attributes {stable_mosaic.version = 11 : i64} {
  func.func @_actor_kernel(%arg0: i32, %arg1: memref<8x32xbf16, #tpu.memory_space<vmem>>, %arg2: memref<32x64xbf16, #tpu.memory_space<vmem>>, %arg3: memref<1x64xf32, #tpu.memory_space<vmem>>, %arg4: memref<64x32xbf16, #tpu.memory_space<vmem>>, %arg5: memref<1x32xf32, #tpu.memory_space<vmem>>, %arg6: memref<32x128xbf16, #tpu.memory_space<vmem>>, %arg7: memref<1x128xf32, #tpu.memory_space<vmem>>, %arg8: memref<8x128xf32, #tpu.memory_space<vmem>>) attributes {dimension_semantics = [#tpu.dimension_semantics<parallel>], iteration_bounds = array<i64: 1>, scalar_prefetch = 0 : i64, scratch_operands = 0 : i64, tpu.core_type = #tpu.core_type<tc>, window_params = [{transform_indices = @transform_0, window_bounds = array<i64: 8, 32>}, {pipeline_mode = #tpu.pipeline_mode<synchronous>, transform_indices = @transform_1, window_bounds = array<i64: 32, 64>}, {pipeline_mode = #tpu.pipeline_mode<synchronous>, transform_indices = @transform_2, window_bounds = array<i64: 1, 64>}, {pipeline_mode = #tpu.pipeline_mode<synchronous>, transform_indices = @transform_3, window_bounds = array<i64: 64, 32>}, {pipeline_mode = #tpu.pipeline_mode<synchronous>, transform_indices = @transform_4, window_bounds = array<i64: 1, 32>}, {pipeline_mode = #tpu.pipeline_mode<synchronous>, transform_indices = @transform_5, window_bounds = array<i64: 32, 128>}, {pipeline_mode = #tpu.pipeline_mode<synchronous>, transform_indices = @transform_6, window_bounds = array<i64: 1, 128>}, {transform_indices = @transform_7, window_bounds = array<i64: 8, 128>}]} {
    %c0 = arith.constant 0 : index
    %c0_0 = arith.constant 0 : index
    %0 = vector.load %arg1[%c0, %c0_0] : memref<8x32xbf16, #tpu.memory_space<vmem>>, vector<8x32xbf16>
    %c0_1 = arith.constant 0 : index
    %c0_2 = arith.constant 0 : index
    %1 = vector.load %arg2[%c0_1, %c0_2] : memref<32x64xbf16, #tpu.memory_space<vmem>>, vector<32x64xbf16>
    %cst = arith.constant dense<0.000000e+00> : vector<8x64xf32>
    %2 = tpu.matmul %0, %1, %cst {dimension_numbers = #tpu.dot_dimension_numbers<[1], [0], [0], [1], [0, 0, 1, 1], [], []>} : vector<8x32xbf16>, vector<32x64xbf16>, vector<8x64xf32> -> vector<8x64xf32>
    %c0_3 = arith.constant 0 : index
    %c0_4 = arith.constant 0 : index
    %3 = vector.load %arg3[%c0_3, %c0_4] : memref<1x64xf32, #tpu.memory_space<vmem>>, vector<1x64xf32>
    %4 = vector.broadcast %3 : vector<1x64xf32> to vector<8x64xf32>
    %5 = arith.addf %2, %4 : vector<8x64xf32>
    %cst_5 = arith.constant 0.000000e+00 : f32
    %6 = vector.broadcast %cst_5 : f32 to vector<8x64xf32>
    %7 = arith.maximumf %5, %6 : vector<8x64xf32>
    %8 = arith.truncf %7 : vector<8x64xf32> to vector<8x64xbf16>
    %c0_6 = arith.constant 0 : index
    %c0_7 = arith.constant 0 : index
    %9 = vector.load %arg4[%c0_6, %c0_7] : memref<64x32xbf16, #tpu.memory_space<vmem>>, vector<64x32xbf16>
    %cst_8 = arith.constant dense<0.000000e+00> : vector<8x32xf32>
    %10 = tpu.matmul %8, %9, %cst_8 {dimension_numbers = #tpu.dot_dimension_numbers<[1], [0], [0], [1], [0, 0, 1, 1], [], []>} : vector<8x64xbf16>, vector<64x32xbf16>, vector<8x32xf32> -> vector<8x32xf32>
    %c0_9 = arith.constant 0 : index
    %c0_10 = arith.constant 0 : index
    %11 = vector.load %arg5[%c0_9, %c0_10] : memref<1x32xf32, #tpu.memory_space<vmem>>, vector<1x32xf32>
    %12 = vector.broadcast %11 : vector<1x32xf32> to vector<8x32xf32>
    %13 = arith.addf %10, %12 : vector<8x32xf32>
    %cst_11 = arith.constant 0.000000e+00 : f32
    %14 = vector.broadcast %cst_11 : f32 to vector<8x32xf32>
    %15 = arith.maximumf %13, %14 : vector<8x32xf32>
    %16 = arith.truncf %15 : vector<8x32xf32> to vector<8x32xbf16>
    %c0_12 = arith.constant 0 : index
    %c0_13 = arith.constant 0 : index
    %17 = vector.load %arg6[%c0_12, %c0_13] : memref<32x128xbf16, #tpu.memory_space<vmem>>, vector<32x128xbf16>
    %cst_14 = arith.constant dense<0.000000e+00> : vector<8x128xf32>
    %18 = tpu.matmul %16, %17, %cst_14 {dimension_numbers = #tpu.dot_dimension_numbers<[1], [0], [0], [1], [0, 0, 1, 1], [], []>} : vector<8x32xbf16>, vector<32x128xbf16>, vector<8x128xf32> -> vector<8x128xf32>
    %c0_15 = arith.constant 0 : index
    %c0_16 = arith.constant 0 : index
    %19 = vector.load %arg7[%c0_15, %c0_16] : memref<1x128xf32, #tpu.memory_space<vmem>>, vector<1x128xf32>
    %20 = vector.broadcast %19 : vector<1x128xf32> to vector<8x128xf32>
    %21 = arith.addf %18, %20 : vector<8x128xf32>
    %22 = math.tanh %21 : vector<8x128xf32>
    %c0_17 = arith.constant 0 : index
    %c0_18 = arith.constant 0 : index
    %23 = vector.load %arg8[%c0_17, %c0_18] : memref<8x128xf32, #tpu.memory_space<vmem>>, vector<8x128xf32>
    tpu.vector_store %arg8[%c0_17, %c0_18], %22 {strides = array<i32>} : memref<8x128xf32, #tpu.memory_space<vmem>>, vector<8x128xf32>,
    return
  }
  func.func @transform_0(%arg0: i32) -> (i32, i32) {
    %c0_i32 = arith.constant 0 : i32
    %c0_i32_0 = arith.constant 0 : i32
    return %arg0, %c0_i32 : i32, i32
  }
  func.func @transform_1(%arg0: i32) -> (i32, i32) {
    %c0_i32 = arith.constant 0 : i32
    %c0_i32_0 = arith.constant 0 : i32
    %c0_i32_1 = arith.constant 0 : i32
    return %c0_i32, %c0_i32_0 : i32, i32
  }
  func.func @transform_2(%arg0: i32) -> (i32, i32) {
    %c0_i32 = arith.constant 0 : i32
    %c0_i32_0 = arith.constant 0 : i32
    %c0_i32_1 = arith.constant 0 : i32
    return %c0_i32, %c0_i32_0 : i32, i32
  }
  func.func @transform_3(%arg0: i32) -> (i32, i32) {
    %c0_i32 = arith.constant 0 : i32
    %c0_i32_0 = arith.constant 0 : i32
    %c0_i32_1 = arith.constant 0 : i32
    return %c0_i32, %c0_i32_0 : i32, i32
  }
  func.func @transform_4(%arg0: i32) -> (i32, i32) {
    %c0_i32 = arith.constant 0 : i32
    %c0_i32_0 = arith.constant 0 : i32
    %c0_i32_1 = arith.constant 0 : i32
    return %c0_i32, %c0_i32_0 : i32, i32
  }
  func.func @transform_5(%arg0: i32) -> (i32, i32) {
    %c0_i32 = arith.constant 0 : i32
    %c0_i32_0 = arith.constant 0 : i32
    %c0_i32_1 = arith.constant 0 : i32
    return %c0_i32, %c0_i32_0 : i32, i32
  }
  func.func @transform_6(%arg0: i32) -> (i32, i32) {
    %c0_i32 = arith.constant 0 : i32
    %c0_i32_0 = arith.constant 0 : i32
    %c0_i32_1 = arith.constant 0 : i32
    return %c0_i32, %c0_i32_0 : i32, i32
  }
  func.func @transform_7(%arg0: i32) -> (i32, i32) {
    %c0_i32 = arith.constant 0 : i32
    %c0_i32_0 = arith.constant 0 : i32
    return %arg0, %c0_i32 : i32, i32
  }
}

</mosaic_0001>

<bundles_post_ra>
// kernel: tpu_custom_call.1
= control target key start
LH: loop header
LB: loop body
LE: loop exit
PB: predicated region body
PF: predicated region fallthrough
CT: control target
= control target key end

     0   :  { %v355_v1 = vmov 0.0   ;;  %vm356_vm0 = vmmov 0   ;;  %vm52_vm1 = vcmask 261120   ;;  %s451_s0 = inlined_call_operand.vmem [shape: bf16[8,32], index: 0, kind: input, shape index: {}]   ;;  %s452_s1 = inlined_call_operand.vmem [shape: bf16[32,64], index: 1, kind: input, shape index: {}]   ;;  %s453_s2 = inlined_call_operand.vmem [shape: f32[1,64], index: 2, kind: input, shape index: {}]   ;;  %s454_s3 = inlined_call_operand.vmem [shape: bf16[64,32], index: 3, kind: input, shape index: {}]   ;;  %s455_s4 = inlined_call_operand.vmem [shape: f32[1,32], index: 4, kind: input, shape index: {}]   ;;  %s456_s5 = inlined_call_operand.vmem [shape: bf16[32,128], index: 5, kind: input, shape index: {}]   ;;  %s457_s6 = inlined_call_operand.vmem [shape: f32[1,128], index: 6, kind: input, shape index: {}]   ;;  %s458_s7 = inlined_call_operand.hbm [shape: f32[8,128], index: 7, kind: output, shape index: {}]  }
   0x1   :  { %v321_v0 = vld [vmem:[%s452_s1] sm:$0xff]   ;;  %290 = vmatprep.subr.bf16.mxu0 %v355_v1  ;;  %298 = vmatprep.subr.bf16.mxu1 %v355_v1  ;;  %v322_v2 = vld [vmem:[%s452_s1 + $0x8] sm:$0xff]  }
   0x2   :  { %291 = vmatpush3.bf16.msra.mxu0 %v321_v0  ;;  %294 = vmatprep.mubr.msk.bf16.mxu0 %vm356_vm0, %v355_v1  ;;  %v323_v3 = vld [vmem:[%s454_s3] sm:$0xff]   ;;  %v324_v5 = vld [vmem:[%s454_s3 + $0x8] sm:$0xff]  }
   0x3   :  { %292 = vmatprep.subr.bf16.mxu0 %v355_v1  ;;  %306 = vmatprep.mubr.msk.bf16.mxu1 %vm356_vm0, %v355_v1  ;;  %v28_v4 = vld [vmem:[%s451_s0] sm:$0xf] }
   0x4   :  { %299 = vmatpush3.bf16.msra.mxu1 %v323_v3 }
   0x5   :  { %300 = vmatprep.subr.bf16.mxu1 %v355_v1 }
   0x6   :  { %293 = vmatpush3.bf16.msra.mxu0 %v322_v2 }
   0x7   :  { %310 = vmatprep.subr.bf16.mxu0 %v355_v1 }
   0x8   :  { %12 = vsyncpa [#allocation3], 0  ;;  %301 = vmatpush3.bf16.msra.mxu1 %v324_v5  ;;  %v325_v6 = vld [vmem:[%s454_s3 + $0x10] sm:$0xff]   ;;  %v326_v7 = vld [vmem:[%s454_s3 + $0x18] sm:$0xff]   ;;  %vm137_vm2 = vcmask 523264  }
   0x9   :  { %295 = vmatmul.mubr.msk.bf16.vlgmr.msra.gmra.mrb[0].mxu0 %vm52_vm1, %v28_v4  ;;  %302 = vmatprep.subr.bf16.mxu1 %v355_v1  ;;  %v327_v8 = vld [vmem:[%s456_s5] sm:$0xff]   ;;  %v328_v17 = vld [vmem:[%s456_s5 + $0x8] sm:$0xff]  }
   0xa   :  { %314 = vmatprep.mubr.msk.bf16.mxu0 %vm356_vm0, %v355_v1  ;;  %311 = vmatpush3.bf16.msra.mxu0 %v327_v8  ;;  %v265_v9 = vld [vmem:[%s453_s2] ss:$0 sm:$0xff] }
   0xb   :  { %312 = vmatprep.subr.bf16.mxu0 %v355_v1  ;;  %v269_v18 = vld [vmem:[%s455_s4] ss:$0 sm:$0xff]  ;;  %s357_s4 = smov [#allocation2]  }
   0xc   :  { %303 = vmatpush3.bf16.msra.mxu1 %v325_v6  ;;  %v275_v26 = vld [vmem:[%s457_s6] ss:$0 sm:$0xff]  ;;  %s257_s5 = sshll.u32 %s357_s4, 4  ;;  %s258_s5 = int_to_ptr.vmem [resolvable:$true] %s257_s5 }
   0xd   :  { %304 = vmatprep.subr.bf16.mxu1 %v355_v1  ;;  %s331_s21 = scalar_lea.vmem %s258_s5, 128  ;;  %p336_p1 = scmp.lt.s32.totalorder %s258_s5, %s258_s5 }
   0xe   :  { %313 = vmatpush3.bf16.msra.mxu0 %v328_v17  ;;  %p332_p0 = scmp.ne.s32.totalorder %s258_s5, %s331_s21  ;;  %p337_p2 = scmp.lt.s32.totalorder %s331_s21, %s331_s21 }
  0x10   :  { %305 = vmatpush3.bf16.msra.mxu1 %v326_v7  ;;  %p338_p3 = por %p337_p2, %p336_p1 }
  0x12   :  { %p339_p4 = pnand %p338_p3, %p332_p0 }
  0xdc   :  { %v90_v10 = vpop.f32.mrb[0].mxu0 }
  0xdd   :  { %v91_v11 = vadd.f32 %v265_v9, %v90_v10  ;;  %v296_v12 = vpop.f32.mrb[1].mxu0 }
  0xde   :  { %v93_v13 = vpop.f32.mrb[2].mxu0 }
  0xdf   :  { %v96_v14 = vmax.f32 %v91_v11, 0.0  ;;  %v297_v15 = vpop.f32.mrb[3].mxu0 }
  0xe1   :  { %v97_v16 = vpack.c.bf16 %v96_v14, %v96_v14 }
  0xe3   :  { %307 = vmatmul.mubr.msk.bf16.vlgmr.msra.gmra.mrb[0].mxu1 %vm137_vm2, %v97_v16 }
 0x1b6   :  { %v175_v19 = vpop.f32.mrb[0].mxu1 }
 0x1b7   :  { %v176_v20 = vadd.f32 %v269_v18, %v175_v19  ;;  %v308_v21 = vpop.f32.mrb[1].mxu1 }
 0x1b8   :  { %v178_v22 = vpop.f32.mrb[2].mxu1 }
 0x1b9   :  { %v181_v23 = vmax.f32 %v176_v20, 0.0  ;;  %v309_v24 = vpop.f32.mrb[3].mxu1 }
 0x1bb   :  { %v182_v25 = vpack.c.bf16 %v181_v23, %v181_v23 }
 0x1bd   :  { %315 = vmatmul.mubr.msk.bf16.vlgmr.msra.gmra.mrb[4].mxu0 %vm52_vm1, %v182_v25 }
 0x290   :  { %v243_v27 = vpop.f32.mrb[4].mxu0 }
 0x291   :  { %v244_v28 = vadd.f32 %v275_v26, %v243_v27  ;;  %v316_v29 = vpop.f32.mrb[5].mxu0 }
 0x292   :  { %v246_v30 = vpop.f32.mrb[6].mxu0 }
 0x293   :  { %329 = vtanh.f32 %v244_v28  ;;  %v317_v31 = vpop.f32.mrb[7].mxu0 }
 0x29d   :  { %v330_v32 = vpop.eup %329 }
 0x29e   :  { %250 = vst [vmem:[#allocation2] sm:$0xff] %v330_v32 }
 0x29f   :  { %342 = shalt.err (!%p339_p4)
}
 0x2a0   :  { %s343_s23 = scalar_lea.hbm %s458_s7, 128 }
 0x2a1   :  { %p344_p5 = scmp.ne.s32.totalorder %s458_s7, %s343_s23  ;;  %p347_p6 = scmp.lt.u32.totalorder %s343_s23, %s458_s7 }
 0x2a3   :  { %p349_p7 = pnand %p347_p6, %p344_p5 }
 0x2a5   :  { %352 = shalt.err (!%p349_p7)
}
 0x2a6   :  { %260 = dma.vmem_to_hbm [thread:$0]  %s258_s5, 128, %s458_s7, [#allocation3]  }
 0x2a7   :  { %353 = dma.done.wait [#allocation3], 128  }
 0x2a8   :  { %354 = vsyncadd [#allocation3], 4294967168 }
 0x2a9   :  { %264 = vsyncpa [#allocation3], 1 }

</bundles_post_ra>
